<compile_context>
chip_gen: v6e
topology: v6e:2x2x1
jax: 0.10.0
libtpu: 0.0.40
codegen_flags: <defaults>
</compile_context>

<pallas_src>
import functools

import jax
import jax.numpy as jnp
from jax import lax
from jax.experimental import pallas as pl
from jax.experimental.pallas import tpu as pltpu


def _masked_scatter_kernel(slab_ref, o_ref, *, n, k):
    # slab_ref: (1, W) f32; lanes [0:n)=x, [n:2n)=mask (0/1), [2n:2n+k)=y.
    slab = slab_ref[...]
    x = slab[:, 0:n]              # (1, n)
    m = slab[:, n:2 * n]          # (1, n)  0.0 / 1.0
    y = slab[:, 2 * n:2 * n + k]  # (1, k)

    # Exclusive prefix count of True entries before each flat position i,
    # via a strictly-lower-triangular matmul on the MXU:
    #   prefix = m @ T,  T[j, i] = 1.0 iff j < i.
    j_ids = lax.broadcasted_iota(jnp.int32, (n, n), 0)
    i_ids = lax.broadcasted_iota(jnp.int32, (n, n), 1)
    tri = (j_ids < i_ids).astype(jnp.float32)
    prefix = jnp.dot(m, tri, preferred_element_type=jnp.float32)  # (1, n)

    # Ordered gather: gathered[i] = y[prefix[i]] for masked i, via a one-hot
    # (k, n) selection contracted on the MXU.  Columns of unmasked positions
    # are zeroed by multiplying with m, so they contribute nothing.
    s_ids = lax.broadcasted_iota(jnp.int32, (k, n), 0).astype(jnp.float32)
    onehot = jnp.equal(s_ids, prefix).astype(jnp.float32) * m       # (k, n)
    gathered = jnp.dot(y, onehot, preferred_element_type=jnp.float32)  # (1, n)

    o_ref[...] = jnp.where(m > 0.0, gathered, x)


def masked_scatter(x, mask, y):
    """Pallas equivalent of torch.masked_scatter(x, mask, y)."""
    assert x.shape == mask.shape, "mask must match x shape"
    n = x.size
    k = y.size
    # TODO(synk): torch.masked_scatter raises if popcount(mask) > y.size; this
    # kernel would silently write 0.0 there (cannot happen for 4x4 / 8x8).

    # Pack everything into one lane-dense slab (multiple of 128 lanes).
    width = max(128, ((2 * n + k + 127) // 128) * 128)
    x_flat = x.reshape(1, n).astype(jnp.float32)
    m_flat = mask.reshape(1, n).astype(jnp.float32)
    y_flat = y.reshape(1, k).astype(jnp.float32)
    pad = jnp.zeros((1, width - (2 * n + k)), jnp.float32)
    slab = jnp.concatenate([x_flat, m_flat, y_flat, pad], axis=1)  # (1, width)

    out_row = pl.pallas_call(
        functools.partial(_masked_scatter_kernel, n=n, k=k),
        out_shape=jax.ShapeDtypeStruct((1, n), jnp.float32),
        in_specs=[pl.BlockSpec(memory_space=pltpu.MemorySpace.VMEM)],
        out_specs=pl.BlockSpec(memory_space=pltpu.MemorySpace.VMEM),
    )(slab)

    return out_row.reshape(x.shape)


if __name__ == "__main__":
    key = jax.random.PRNGKey(0)
    k1, k2, k3 = jax.random.split(key, 3)

    # Shapes from the module annotation: x [4,4] f32, mask [4,4] bool, y [8,8] f32.
    x = jax.random.normal(k1, (4, 4), dtype=jnp.float32)
    mask = jax.random.bernoulli(k2, 0.5, (4, 4))
    y = jax.random.normal(k3, (8, 8), dtype=jnp.float32)

    out = masked_scatter(x, mask, y)
    out = jax.block_until_ready(out)

    # Pure-JAX reference of torch.masked_scatter semantics.
    m_flat = mask.reshape(-1)
    prefix = jnp.cumsum(m_flat.astype(jnp.int32)) - m_flat.astype(jnp.int32)
    gathered = y.reshape(-1)[prefix]
    ref = jnp.where(m_flat, gathered, x.reshape(-1)).reshape(x.shape)

    assert out.shape == (4, 4) and out.dtype == jnp.float32
    assert jnp.allclose(out, ref), "mismatch vs reference masked_scatter"

    print("KERNEL_OK")
</pallas_src>

<mosaic_0001>
module attributes {stable_mosaic.version = 11 : i64} {
  func.func @_masked_scatter_kernel(%arg0: memref<1x128xf32, #tpu.memory_space<vmem>>, %arg1: memref<1x16xf32, #tpu.memory_space<vmem>>) attributes {dimension_semantics = [], scalar_prefetch = 0 : i64, scratch_operands = 0 : i64, tpu.core_type = #tpu.core_type<tc>} {
    %c0 = arith.constant 0 : index
    %c0_0 = arith.constant 0 : index
    %0 = vector.load %arg0[%c0, %c0_0] : memref<1x128xf32, #tpu.memory_space<vmem>>, vector<1x128xf32>
    %1 = vector.extract_strided_slice %0 {offsets = [0, 0], sizes = [1, 16], strides = [1, 1]} : vector<1x128xf32> to vector<1x16xf32>
    %2 = vector.extract_strided_slice %0 {offsets = [0, 16], sizes = [1, 16], strides = [1, 1]} : vector<1x128xf32> to vector<1x16xf32>
    %3 = vector.extract_strided_slice %0 {offsets = [0, 32], sizes = [1, 64], strides = [1, 1]} : vector<1x128xf32> to vector<1x64xf32>
    %4 = tpu.iota {dimensions = array<i32: 0>} : vector<16x16xi32>
    %5 = tpu.iota {dimensions = array<i32: 1>} : vector<16x16xi32>
    %6 = arith.cmpi slt, %4, %5 : vector<16x16xi32>
    %7 = arith.extui %6 : vector<16x16xi1> to vector<16x16xi32>
    %8 = arith.sitofp %7 : vector<16x16xi32> to vector<16x16xf32>
    %cst = arith.constant dense<0.000000e+00> : vector<1x16xf32>
    %9 = tpu.matmul %2, %8, %cst {dimension_numbers = #tpu.dot_dimension_numbers<[1], [0], [0], [1], [0, 0, 1, 1], [], []>} : vector<1x16xf32>, vector<16x16xf32>, vector<1x16xf32> -> vector<1x16xf32>
    %10 = tpu.iota {dimensions = array<i32: 0>} : vector<64x16xi32>
    %11 = arith.sitofp %10 : vector<64x16xi32> to vector<64x16xf32>
    %12 = vector.broadcast %9 : vector<1x16xf32> to vector<64x16xf32>
    %13 = arith.cmpf oeq, %11, %12 : vector<64x16xf32>
    %14 = arith.extui %13 : vector<64x16xi1> to vector<64x16xi32>
    %15 = arith.sitofp %14 : vector<64x16xi32> to vector<64x16xf32>
    %16 = vector.broadcast %2 : vector<1x16xf32> to vector<64x16xf32>
    %17 = arith.mulf %15, %16 : vector<64x16xf32>
    %cst_1 = arith.constant dense<0.000000e+00> : vector<1x16xf32>
    %18 = tpu.matmul %3, %17, %cst_1 {dimension_numbers = #tpu.dot_dimension_numbers<[1], [0], [0], [1], [0, 0, 1, 1], [], []>} : vector<1x64xf32>, vector<64x16xf32>, vector<1x16xf32> -> vector<1x16xf32>
    %cst_2 = arith.constant 0.000000e+00 : f32
    %19 = vector.broadcast %cst_2 : f32 to vector<1x16xf32>
    %20 = arith.cmpf ogt, %2, %19 : vector<1x16xf32>
    %21 = arith.select %20, %18, %1 : vector<1x16xi1>, vector<1x16xf32>
    %c0_3 = arith.constant 0 : index
    %c0_4 = arith.constant 0 : index
    %22 = vector.load %arg1[%c0_3, %c0_4] : memref<1x16xf32, #tpu.memory_space<vmem>>, vector<1x16xf32>
    tpu.vector_store %arg1[%c0_3, %c0_4], %21 {strides = array<i32>} : memref<1x16xf32, #tpu.memory_space<vmem>>, vector<1x16xf32>,
    return
  }
}

</mosaic_0001>

<bundles_post_ra>
// kernel: tpu_custom_call.1
= control target key start
LH: loop header
LB: loop body
LE: loop exit
PB: predicated region body
PF: predicated region fallthrough
CT: control target
= control target key end

     0   :  { %6 = vsyncpa [#allocation3], 0  ;;  %s462_s0 = inlined_call_operand.hbm [shape: f32[1,128], index: 0, kind: input, shape index: {}]   ;;  %s463_s1 = inlined_call_operand.hbm [shape: f32[1,16], index: 1, kind: output, shape index: {}]  }
   0x1   :  { %7 = vsyncpa [#allocation4], 0  ;;  %s392_s6 = smov [#allocation2]  }
   0x2   :  { %s14_s7 = sshll.u32 %s392_s6, 4  ;;  %s15_s7 = int_to_ptr.vmem [resolvable:$true] %s14_s7 }
   0x3   :  { %s356_s8 = scalar_lea.vmem %s15_s7, 16  ;;  %s360_s9 = scalar_lea.vmem %s15_s7, 32 }
   0x4   :  { %p357_p0 = scmp.ne.s32.totalorder %s15_s7, %s356_s8  ;;  %p361_p1 = scmp.lt.s32.totalorder %s15_s7, %s15_s7 }
   0x5   :  { %p362_p2 = scmp.lt.s32.totalorder %s360_s9, %s356_s8 }
   0x7   :  { %p363_p3 = por %p362_p2, %p361_p1 }
   0x9   :  { %p364_p4 = pnand %p363_p3, %p357_p0 }
   0xb   :  { %367 = shalt.err (!%p364_p4)
}
   0xc   :  { %17 = dma.hbm_to_vmem [thread:$0]  %s462_s0, 16, %s15_s7, [#allocation3]  }
   0xd   :  { %388 = dma.done.wait [#allocation3], 16  }
   0xe   :  { %389 = vsyncadd [#allocation3], 4294967280  ;;  %v22_v0 = vlaneseq  ;;  %v393_v1 = vmov 0.0   ;;  %vm394_vm0 = vmmov 0   ;;  %v425_v6 = vld [vmem:[#allocation2] sm:$0x1] }
   0xf   :  { %313 = vmatprep.subr.mxu0 %v393_v1  ;;  %317 = vmatprep.mubr.msk.f32.mxu0 %vm394_vm0, %v393_v1  ;;  %v395_v7 = vmov 1.0   ;;  %s396_s0 = smov 112   ;;  %s397_s12 = smov 96   ;;  %vm40_vm3 = vcmask 130048   ;;  %vm166_vm12 = vcmask 523264   ;;  %vm239_vm13 = vcmp.gt.f32.partialorder %v425_v6, 0.0 }
  0x10   :  { %v416_v2 = vshrl.u32 %v22_v0, 7  ;;  %v26_v3 = vand.u32 127, %v22_v0  ;;  %320 = vmatprep.subr.mxu1 %v393_v1  ;;  %336 = vmatprep.mubr.msk.f32.mxu1 %vm394_vm0, %v393_v1  ;;  %v398_v44 = vmov 1966171168   ;;  %s399_s13 = smov 16   ;;  %s400_s14 = smov [#allocation5]  }
  0x11   :  { %v242_v45 = vunpack.c.l.s4 %v398_v44  ;;  %s278_s15 = sshll.u32 %s400_s14, 4  ;;  %vm270_vm14 = vcmask 122880   ;;  %s279_s15 = int_to_ptr.vmem [resolvable:$true] %s278_s15 }
  0x12   :  { %v421_v4 = vsub.s32 0, %v416_v2  ;;  %v24_v5 = vadd.s32 8, %v416_v2  ;;  %vm27_vm2 = vcmp.lt.s32.totalorder %v416_v2, %v26_v3  ;;  %v118_v10 = vadd.s32 56, %v416_v2  ;;  %s368_s16 = scalar_lea.vmem %s279_s15, 16  ;;  %s372_s17 = scalar_lea.vmem %s279_s15, 32 }
  0x13   :  { %v117_v11 = vadd.s32 48, %v416_v2  ;;  %v116_v12 = vadd.s32 40, %v416_v2  ;;  %v115_v13 = vadd.s32 32, %v416_v2  ;;  %v114_v17 = vadd.s32 24, %v416_v2  ;;  %p369_p5 = scmp.ne.s32.totalorder %s279_s15, %s368_s16  ;;  %p373_p6 = scmp.lt.s32.totalorder %s279_s15, %s279_s15 }
  0x14   :  { %vm28_vm1 = vcmp.lt.s32.totalorder %v24_v5, %v26_v3  ;;  %v37_v8 = vrot.slane %v425_v6, %v421_v4  ;;  %v126_v14 = vcvt.s32.f32 %v118_v10  ;;  %v113_v21 = vadd.s32 16, %v416_v2  ;;  %p374_p7 = scmp.lt.s32.totalorder %s372_s17, %s368_s16 }
  0x15   :  { %314 = vmatpush3.msk.msra.mxu0 %vm28_vm1, %v395_v7  ;;  %v125_v15 = vcvt.s32.f32 %v117_v11  ;;  %v124_v16 = vcvt.s32.f32 %v116_v12  ;;  %v123_v20 = vcvt.s32.f32 %v115_v13  ;;  %v122_v23 = vcvt.s32.f32 %v114_v17 }
  0x16   :  { %315 = vmatprep.subr.mxu0 %v393_v1  ;;  %38 = vrot.lane.b32.xlu0 %v37_v8, %s396_s0  ;;  %v121_v27 = vcvt.s32.f32 %v113_v21  ;;  %v120_v29 = vcvt.s32.f32 %v24_v5  ;;  %v119_v33 = vcvt.s32.f32 %v416_v2  ;;  %v243_v46 = vunpack.c.0.s8 %v242_v45  ;;  %p375_p8 = por %p374_p7, %p373_p6 }
  0x17   :  { %316 = vmatpush3.msk.msra.mxu0 %vm27_vm2, %v395_v7 }
  0x18   :  { %v246_v47 = vsub.s32 %v243_v46, %v416_v2  ;;  %p376_p9 = pnand %p375_p8, %p369_p5 }
  0x1a   :  { %164 = vrot.lane.b32.xlu0 %v37_v8, %s397_s12 }
  0x88   :  { %v39_v9 = vpop.permute.xlu0 %38 }
  0x89   :  { %318 = vmatmul.mubr.msk.f32.vlgmr.msra.gmra.mxu0 %vm40_vm3, %v39_v9 }
  0x8c   :  { %v165_v43 = vpop.permute.xlu0 %164 }
 0x149   :  { %v109_v18 = vpop.f32.mrf.mxu0 }
 0x14a   :  { %v130_v19 = vrot.slane %v109_v18, %v421_v4 }
 0x14b   :  { %v319_v22 = vpop.f32.mrf.mxu0 }
 0x14c   :  { %vm138_vm4 = vcmp.eq.f32.partialorder %v126_v14, %v130_v19  ;;  %vm137_vm5 = vcmp.eq.f32.partialorder %v125_v15, %v130_v19  ;;  %vm136_vm6 = vcmp.eq.f32.partialorder %v124_v16, %v130_v19  ;;  %vm135_vm7 = vcmp.eq.f32.partialorder %v123_v20, %v130_v19 }
 0x14d   :  { %v299_v24 = vsel %vm138_vm4, 1.0, %v393_v1  ;;  %v298_v25 = vsel %vm137_vm5, 1.0, %v393_v1  ;;  %v297_v28 = vsel %vm136_vm6, 1.0, %v393_v1  ;;  %vm134_vm8 = vcmp.eq.f32.partialorder %v122_v23, %v130_v19 }
 0x14e   :  { %v163_v26 = vmul.f32 %v299_v24, %v39_v9  ;;  %v162_v30 = vmul.f32 %v298_v25, %v39_v9  ;;  %v296_v31 = vsel %vm135_vm7, 1.0, %v393_v1  ;;  %v161_v32 = vmul.f32 %v297_v28, %v39_v9 }
 0x14f   :  { %vm133_vm9 = vcmp.eq.f32.partialorder %v121_v27, %v130_v19  ;;  %v295_v34 = vsel %vm134_vm8, 1.0, %v393_v1  ;;  %v160_v35 = vmul.f32 %v296_v31, %v39_v9  ;;  %vm132_vm10 = vcmp.eq.f32.partialorder %v120_v29, %v130_v19 }
 0x150   :  { %321 = vmatpush3.msra.mxu1 %v163_v26  ;;  %v294_v36 = vsel %vm133_vm9, 1.0, %v393_v1  ;;  %v159_v37 = vmul.f32 %v295_v34, %v39_v9  ;;  %vm131_vm11 = vcmp.eq.f32.partialorder %v119_v33, %v130_v19  ;;  %v293_v38 = vsel %vm132_vm10, 1.0, %v393_v1 }
 0x151   :  { %322 = vmatprep.subr.mxu1 %v393_v1  ;;  %v158_v39 = vmul.f32 %v294_v36, %v39_v9  ;;  %v292_v40 = vsel %vm131_vm11, 1.0, %v393_v1  ;;  %v157_v41 = vmul.f32 %v293_v38, %v39_v9 }
 0x152   :  { %323 = vmatpush3.msra.mxu1 %v162_v30  ;;  %v156_v42 = vmul.f32 %v292_v40, %v39_v9 }
 0x153   :  { %324 = vmatprep.subr.mxu1 %v393_v1 }
 0x154   :  { %325 = vmatpush3.msra.mxu1 %v161_v32 }
 0x155   :  { %326 = vmatprep.subr.mxu1 %v393_v1 }
 0x156   :  { %327 = vmatpush3.msra.mxu1 %v160_v35 }
 0x157   :  { %328 = vmatprep.subr.mxu1 %v393_v1 }
 0x158   :  { %329 = vmatpush3.msra.mxu1 %v159_v37 }
 0x159   :  { %330 = vmatprep.subr.mxu1 %v393_v1 }
 0x15a   :  { %331 = vmatpush3.msra.mxu1 %v158_v39 }
 0x15b   :  { %332 = vmatprep.subr.mxu1 %v393_v1 }
 0x15c   :  { %333 = vmatpush3.msra.mxu1 %v157_v41 }
 0x15d   :  { %334 = vmatprep.subr.mxu1 %v393_v1 }
 0x15e   :  { %335 = vmatpush3.msra.mxu1 %v156_v42 }
 0x15f   :  { %337 = vmatmul.mubr.msk.f32.vlgmr.msra.gmra.mxu1 %vm166_vm12, %v165_v43 }
 0x21f   :  { %v235_v48 = vpop.f32.mrf.mxu1 }
 0x220   :  { %v247_v49 = vrot.slane %v235_v48, %v246_v47 }
 0x221   :  { %v338_v50 = vpop.f32.mrf.mxu1 }
 0x222   :  { %v254_v51 = vrot.slane %v247_v49, %v246_v47 }
 0x224   :  { %255 = vrot.lane.b32.xlu1 %v254_v51, %s399_s13 }
 0x228   :  { %258 = vrot.lane.b32.xlu1 %v425_v6, %s399_s13 }
 0x296   :  { %v256_v52 = vpop.permute.xlu1 %255 }
 0x29a   :  { %v259_v53 = vpop.permute.xlu1 %258 }
 0x29b   :  { %v261_v54 = vsel %vm239_vm13, %v256_v52, %v259_v53 }
 0x29c   :  { %v266_v55 = vrot.slane %v261_v54, %v421_v4 }
 0x29e   :  { %267 = vrot.lane.b32.xlu0 %v266_v55, %s396_s0 }
 0x310   :  { %v268_v56 = vpop.permute.xlu0 %267 }
 0x311   :  { %271 = vst.msk [vmem:[#allocation5] sm:$0x1] %vm270_vm14, %v268_v56 }
 0x312   :  { %379 = shalt.err (!%p376_p9)
}
 0x313   :  { %281 = dma.vmem_to_hbm [thread:$0]  %s279_s15, 16, %s463_s1, [#allocation4]  }
 0x314   :  { %390 = dma.done.wait [#allocation4], 16  }
 0x315   :  { %391 = vsyncadd [#allocation4], 4294967280 }
 0x316   :  { %285 = vsyncpa [#allocation3], 1 }
 0x317   :  { %286 = vsyncpa [#allocation4], 1 }

</bundles_post_ra>
